<compile_context>
chip_gen: v6e
topology: v6e:2x2x1
jax: 0.10.0
libtpu: 0.0.40
codegen_flags: <defaults>
</compile_context>

<pallas_src>
import functools

import jax
import jax.numpy as jnp
from jax import lax
from jax.experimental import pallas as pl
from jax.experimental.pallas import tpu as pltpu

EPS = 1e-5
_LANE = 128

_ACTIVATIONS = {
    "relu": lambda v: jnp.maximum(v, 0.0),
    "leaky_relu": lambda v: jnp.where(v > 0, v, 0.2 * v),
    "tanh": jnp.tanh,
    "identity": lambda v: v,
}


def _round_up(x, m):
    return (x + m - 1) // m * m


def _ceil_div(a, b):
    return -(-a // b)


def _vmem_budget_and_limit():
    """Generation-aware VMEM sizing (v7x: 64 MiB/TC, v5e/v6e: 128 MiB)."""
    try:
        cap = pltpu.get_tpu_info().vmem_capacity_bytes
    except Exception:                       # conservative fallback
        cap = 64 * 1024 * 1024
    if cap >= 100 * 1024 * 1024:            # v5e / v6e (128 MiB physical)
        return 44 * 1024 * 1024, 64 * 1024 * 1024
    return 30 * 1024 * 1024, 44 * 1024 * 1024   # v7x-style 64 MiB VMEM


def _pass1_vmem_bytes(tm, kp, c_pad):
    # double-buffered bf16 patches + bf16 weights (counted x2, conservative:
    # they only change on the outer phase axis) + bf16 y tile + f32 stats tile
    return (2 * tm * kp * 2) + (2 * kp * c_pad * 2) + (2 * tm * c_pad * 2) \
        + (2 * 2 * c_pad * 4)


# --------------------------------------------------------------------- pass 1
def _matmul_stats_kernel(p_ref, w_ref, y_ref, stats_ref):
    """One (phase, M-tile): bf16 MXU matmul with f32 accumulation.

    y is written back in bf16 (halves the inter-pass HBM stream); the BN
    partial sums are taken from the f32 accumulator before the downcast."""
    y = jnp.dot(p_ref[...], w_ref[...], preferred_element_type=jnp.float32)
    y_ref[...] = y.astype(y_ref.dtype)
    s = jnp.sum(y, axis=0, keepdims=True)          # (1, C_pad)
    sq = jnp.sum(y * y, axis=0, keepdims=True)     # (1, C_pad)
    stats_ref[...] = jnp.concatenate([s, sq], axis=0)


# --------------------------------------------------------------------- pass 2
def _bn_act_kernel(y_ref, ab_ref, o_ref, *, act):
    """o = act(y * scale + shift); scale/shift are rows 0/1 of ab (resident)."""
    y = y_ref[...].astype(jnp.float32)
    scale = ab_ref[0:1, :]
    shift = ab_ref[1:2, :]
    o_ref[...] = act(y * scale + shift).astype(o_ref.dtype)


# ----------------------------------------------------------------- JAX glue
def _phase_geometry(in_size, out_size, k, s, p):
    """Per-dimension sub-pixel (stride**2 phase) geometry for ConvTranspose."""
    t = _ceil_div(k, s)                       # taps per phase (zero-padded)
    q = _ceil_div(out_size, s)                # per-phase output extent (padded)
    q_min = [max(0, -((r - p) // s)) for r in range(s)]   # first q per residue
    lpad = t - 1
    rpad = max(0, max(q_min) + q - in_size)
    return t, q, q_min, lpad, rpad


def gen_block(x, w_t, bias, gamma, beta, *, kernel_size, stride, padding,
              activation="relu", out_format="NCHW", out_dtype=jnp.float32):
    """GenBlock forward: ConvTranspose2d -> BatchNorm2d (train mode) -> act.

    x: (N, C_in, H, W) NCHW.  w_t: (C_in, C_out, k, k) (PyTorch layout).
    The deconv bias cancels exactly under training-mode BN and is not applied.
    out_format="NHWC" skips nothing extra here — both layouts cost exactly one
    final XLA transpose (phase interleave), so NCHW stays the default."""
    del bias
    act = _ACTIVATIONS[activation]

    N, C_in, H, W = x.shape
    _, C_out, k, _ = w_t.shape
    s, p = stride, padding
    H_out = (H - 1) * s - 2 * p + k
    W_out = (W - 1) * s - 2 * p + k

    # ---- sub-pixel phase geometry -------------------------------------------
    T, Qh, qmin_h, lp_h, rp_h = _phase_geometry(H, H_out, k, s, p)
    _, Qw, qmin_w, lp_w, rp_w = _phase_geometry(W, W_out, k, s, p)
    P = s * s                                  # number of output phases
    Kp = C_in * T * T                          # taps per phase
    M_ph = N * Qh * Qw                         # rows per phase
    C_pad = _round_up(max(C_out, _LANE), _LANE)   # lane-dense channel axis

    # ---- weights: per-phase taps, K order (t_h, t_w, ci) to match patches ---
    w_pad = jnp.pad(w_t, ((0, 0), (0, 0), (0, T * s - k), (0, T * s - k)))
    w_phases = []
    for o_h in range(s):
        r_h = (o_h + p) % s
        for o_w in range(s):
            r_w = (o_w + p) % s
            wp = w_pad[:, :, r_h::s, r_w::s]             # (C_in, C_out, T, T)
            wp = wp.transpose(2, 3, 0, 1).reshape(Kp, C_out)
            w_phases.append(wp)
    w_all = jnp.stack(w_phases, 0).astype(jnp.bfloat16)  # (P, Kp, C_out)
    w_all = jnp.pad(w_all, ((0, 0), (0, 0), (0, C_pad - C_out)))

    # ---- patches: NHWC slicing + channel-axis concat (no 6-D transpose) -----
    x_nhwc = jnp.pad(x.astype(jnp.bfloat16).transpose(0, 2, 3, 1),
                     ((0, 0), (lp_h, rp_h), (lp_w, rp_w), (0, 0)))
    phase_patches = []
    for o_h in range(s):
        r_h = (o_h + p) % s
        for o_w in range(s):
            r_w = (o_w + p) % s
            taps = []
            for t_h in range(T):
                h0 = qmin_h[r_h] - t_h + lp_h
                for t_w in range(T):
                    w0 = qmin_w[r_w] - t_w + lp_w
                    taps.append(x_nhwc[:, h0:h0 + Qh, w0:w0 + Qw, :])
            pp = jnp.concatenate(taps, axis=-1)          # (N, Qh, Qw, Kp)
            if Qh * s != H_out or Qw * s != W_out:
                # Rows past H_out/W_out only exist to keep phases uniform;
                # zero their patches so the BN statistics stay exact.
                mh = (jnp.arange(Qh) * s + o_h < H_out).astype(pp.dtype)
                mw = (jnp.arange(Qw) * s + o_w < W_out).astype(pp.dtype)
                pp = pp * mh[None, :, None, None] * mw[None, None, :, None]
            phase_patches.append(pp.reshape(M_ph, Kp))
    patches = jnp.stack(phase_patches, 0)                # (P, M_ph, Kp) bf16

    # ---- tile sizing (generation-aware) -------------------------------------
    budget, limit = _vmem_budget_and_limit()
    tm = 1024
    while tm > 64 and _pass1_vmem_bytes(tm, Kp, C_pad) > budget:
        tm //= 2
    tm = min(tm, _round_up(M_ph, 8))           # don't over-pad tiny problems
    M_pad = _round_up(M_ph, tm)
    n_m = M_pad // tm
    if (P * n_m) % 2 == 1 and n_m > 1:         # keep both v7x TensorCores busy
        n_m += 1
        M_pad = n_m * tm
    if M_pad != M_ph:
        # zero patch rows -> zero matmul rows -> inert for the BN partial sums
        patches = jnp.pad(patches, ((0, 0), (0, M_pad - M_ph), (0, 0)))

    cp = pltpu.CompilerParams(dimension_semantics=("parallel", "parallel"),
                              vmem_limit_bytes=limit)

    # ---- pass 1: per-phase tiled matmul + per-tile BN partial sums ----------
    cost1 = pl.CostEstimate(
        flops=2 * P * M_pad * Kp * C_pad,
        transcendentals=0,
        bytes_accessed=(P * M_pad * Kp * 2 + P * Kp * C_pad * 2
                        + P * M_pad * C_pad * 2 + P * n_m * 2 * C_pad * 4))
    y_flat, stats = pl.pallas_call(
        _matmul_stats_kernel,
        out_shape=(jax.ShapeDtypeStruct((P, M_pad, C_pad), jnp.bfloat16),
                   jax.ShapeDtypeStruct((P, n_m, 2, C_pad), jnp.float32)),
        grid=(P, n_m),
        in_specs=[pl.BlockSpec((None, tm, Kp), lambda ph, i: (ph, i, 0)),
                  pl.BlockSpec((None, Kp, C_pad), lambda ph, i: (ph, 0, 0))],
        out_specs=[pl.BlockSpec((None, tm, C_pad), lambda ph, i: (ph, i, 0)),
                   pl.BlockSpec((None, None, 2, C_pad),
                                lambda ph, i: (ph, i, 0, 0))],
        compiler_params=cp,
        cost_estimate=cost1,
    )(patches, w_all)

    # ---- fold BN (training-mode batch stats) into one scale/shift -----------
    tot = jnp.sum(stats, axis=(0, 1))                    # (2, C_pad) f32
    m_total = float(N * H_out * W_out)                   # pad rows sum to zero
    mean = tot[0] / m_total
    var = jnp.maximum(tot[1] / m_total - mean * mean, 0.0)
    gamma_p = jnp.pad(gamma.astype(jnp.float32), (0, C_pad - C_out))
    beta_p = jnp.pad(beta.astype(jnp.float32), (0, C_pad - C_out))
    scale = gamma_p * lax.rsqrt(var + EPS)
    shift = beta_p - mean * scale
    ab = jnp.stack([scale, shift], axis=0)               # (2, C_pad)

    # ---- pass 2: tiled scale/shift + activation (bf16 in, lane-dense out) ---
    cost2 = pl.CostEstimate(
        flops=3 * P * M_pad * C_pad,
        transcendentals=0,
        bytes_accessed=(P * M_pad * C_pad * 2 + 2 * C_pad * 4
                        + P * M_pad * C_pad * jnp.dtype(out_dtype).itemsize))
    out_flat = pl.pallas_call(
        functools.partial(_bn_act_kernel, act=act),
        out_shape=jax.ShapeDtypeStruct((P, M_pad, C_pad), out_dtype),
        grid=(P, n_m),
        in_specs=[pl.BlockSpec((None, tm, C_pad), lambda ph, i: (ph, i, 0)),
                  pl.BlockSpec((2, C_pad), lambda ph, i: (0, 0))],
        out_specs=pl.BlockSpec((None, tm, C_pad), lambda ph, i: (ph, i, 0)),
        compiler_params=cp,
        cost_estimate=cost2,
    )(y_flat, ab)

    # ---- interleave the stride**2 phases back into (H_out, W_out) -----------
    # One XLA transpose, producing the final layout directly (the old separate
    # NHWC->NCHW round trip is gone); phases are ordered by output offset.
    out = out_flat[:, :M_ph, :C_out].reshape(s, s, N, Qh, Qw, C_out)
    if out_format == "NHWC":
        out = out.transpose(2, 3, 0, 4, 1, 5).reshape(N, Qh * s, Qw * s, C_out)
        return out[:, :H_out, :W_out, :]
    out = out.transpose(2, 5, 3, 0, 4, 1).reshape(N, C_out, Qh * s, Qw * s)
    return out[:, :, :H_out, :W_out]


def reference(x, w_t, bias, gamma, beta, *, kernel_size, stride, padding):
    """Pure-JAX f32 reference for correctness check."""
    k = kernel_size
    w_conv = jnp.flip(w_t, axis=(2, 3)).transpose(1, 0, 2, 3)  # (C_out,C_in,k,k)
    out = lax.conv_general_dilated(
        x, w_conv, window_strides=(1, 1),
        padding=[(k - 1 - padding, k - 1 - padding)] * 2,
        lhs_dilation=(stride, stride),
        dimension_numbers=("NCHW", "OIHW", "NCHW"))
    out = out + bias[None, :, None, None]
    mean = out.mean(axis=(0, 2, 3), keepdims=True)
    var = ((out - mean) ** 2).mean(axis=(0, 2, 3), keepdims=True)
    out = (out - mean) * lax.rsqrt(var + EPS)
    out = out * gamma[None, :, None, None] + beta[None, :, None, None]
    return jnp.maximum(out, 0.0)


if __name__ == "__main__":
    # Small DCGAN-style block: in=4 -> out=16, kernel=4, stride=2, padding=1
    N, C_in, H, W = 2, 4, 8, 8
    C_out, K_SZ, STRIDE, PAD = 16, 4, 2, 1

    key = jax.random.PRNGKey(0)
    kx, kw, kb = jax.random.split(key, 3)
    x = jax.random.normal(kx, (N, C_in, H, W), dtype=jnp.float32)
    # deterministic DCGAN-style init: N(0, 0.02) for deconv weights
    w_t = 0.02 * jax.random.normal(kw, (C_in, C_out, K_SZ, K_SZ), jnp.float32)
    bias = 0.02 * jax.random.normal(kb, (C_out,), jnp.float32)
    gamma = jnp.ones((C_out,), jnp.float32)    # BatchNorm2d default init
    beta = jnp.zeros((C_out,), jnp.float32)

    out = gen_block(x, w_t, bias, gamma, beta,
                    kernel_size=K_SZ, stride=STRIDE, padding=PAD,
                    activation="relu")
    out = jax.block_until_ready(out)

    ref = reference(x, w_t, bias, gamma, beta,
                    kernel_size=K_SZ, stride=STRIDE, padding=PAD)
    H_OUT = (H - 1) * STRIDE - 2 * PAD + K_SZ
    W_OUT = (W - 1) * STRIDE - 2 * PAD + K_SZ
    assert out.shape == (N, C_out, H_OUT, W_OUT), out.shape
    err = float(jnp.max(jnp.abs(out - ref)))
    assert err < 2.5e-2, err

    print("KERNEL_OK")
</pallas_src>

<mosaic_0001>
module attributes {stable_mosaic.version = 11 : i64} {
  func.func @_matmul_stats_kernel(%arg0: i32, %arg1: i32, %arg2: memref<1x128x16xbf16, #tpu.memory_space<vmem>>, %arg3: memref<1x16x128xbf16, #tpu.memory_space<vmem>>, %arg4: memref<1x128x128xbf16, #tpu.memory_space<vmem>>, %arg5: memref<1x1x2x128xf32, #tpu.memory_space<vmem>>) attributes {dimension_semantics = [#tpu.dimension_semantics<parallel>, #tpu.dimension_semantics<parallel>], iteration_bounds = array<i64: 4, 1>, scalar_prefetch = 0 : i64, scratch_operands = 0 : i64, tpu.core_type = #tpu.core_type<tc>, window_params = [{transform_indices = @transform_0, window_bounds = array<i64: 1, 128, 16>}, {transform_indices = @transform_1, window_bounds = array<i64: 1, 16, 128>}, {transform_indices = @transform_2, window_bounds = array<i64: 1, 128, 128>}, {transform_indices = @transform_3, window_bounds = array<i64: 1, 1, 2, 128>}]} {
    %c0 = arith.constant 0 : index
    %c0_0 = arith.constant 0 : index
    %c0_1 = arith.constant 0 : index
    %0 = vector.load %arg2[%c0, %c0_0, %c0_1] : memref<1x128x16xbf16, #tpu.memory_space<vmem>>, vector<1x128x16xbf16>
    %1 = vector.shape_cast %0 : vector<1x128x16xbf16> to vector<128x16xbf16>
    %c0_2 = arith.constant 0 : index
    %c0_3 = arith.constant 0 : index
    %c0_4 = arith.constant 0 : index
    %2 = vector.load %arg3[%c0_2, %c0_3, %c0_4] : memref<1x16x128xbf16, #tpu.memory_space<vmem>>, vector<1x16x128xbf16>
    %3 = vector.shape_cast %2 : vector<1x16x128xbf16> to vector<16x128xbf16>
    %cst = arith.constant dense<0.000000e+00> : vector<128x128xf32>
    %4 = tpu.matmul %1, %3, %cst {dimension_numbers = #tpu.dot_dimension_numbers<[1], [0], [0], [1], [0, 0, 1, 1], [], []>} : vector<128x16xbf16>, vector<16x128xbf16>, vector<128x128xf32> -> vector<128x128xf32>
    %5 = arith.truncf %4 : vector<128x128xf32> to vector<128x128xbf16>
    %c0_5 = arith.constant 0 : index
    %c0_6 = arith.constant 0 : index
    %c0_7 = arith.constant 0 : index
    %6 = vector.load %arg4[%c0_5, %c0_6, %c0_7] : memref<1x128x128xbf16, #tpu.memory_space<vmem>>, vector<1x128x128xbf16>
    %7 = vector.shape_cast %6 : vector<1x128x128xbf16> to vector<128x128xbf16>
    %8 = vector.shape_cast %5 : vector<128x128xbf16> to vector<1x128x128xbf16>
    tpu.vector_store %arg4[%c0_5, %c0_6, %c0_7], %8 {strides = array<i32>} : memref<1x128x128xbf16, #tpu.memory_space<vmem>>, vector<1x128x128xbf16>,
    %cst_8 = arith.constant dense<0.000000e+00> : vector<128xf32>
    %9 = vector.multi_reduction <add>, %4, %cst_8 [0] : vector<128x128xf32> to vector<128xf32>
    %10 = vector.shape_cast %9 : vector<128xf32> to vector<1x128xf32>
    %11 = arith.mulf %4, %4 : vector<128x128xf32>
    %cst_9 = arith.constant dense<0.000000e+00> : vector<128xf32>
    %12 = vector.multi_reduction <add>, %11, %cst_9 [0] : vector<128x128xf32> to vector<128xf32>
    %13 = vector.shape_cast %12 : vector<128xf32> to vector<1x128xf32>
    %14 = tpu.concatenate %10, %13 in 0 : vector<1x128xf32>, vector<1x128xf32> -> vector<2x128xf32>
    %c0_10 = arith.constant 0 : index
    %c0_11 = arith.constant 0 : index
    %c0_12 = arith.constant 0 : index
    %c0_13 = arith.constant 0 : index
    %15 = vector.load %arg5[%c0_10, %c0_11, %c0_12, %c0_13] : memref<1x1x2x128xf32, #tpu.memory_space<vmem>>, vector<1x1x2x128xf32>
    %16 = vector.shape_cast %15 : vector<1x1x2x128xf32> to vector<2x128xf32>
    %17 = vector.shape_cast %14 : vector<2x128xf32> to vector<1x1x2x128xf32>
    tpu.vector_store %arg5[%c0_10, %c0_11, %c0_12, %c0_13], %17 {strides = array<i32>} : memref<1x1x2x128xf32, #tpu.memory_space<vmem>>, vector<1x1x2x128xf32>,
    return
  }
  func.func @transform_0(%arg0: i32, %arg1: i32) -> (i32, i32, i32) {
    %c0_i32 = arith.constant 0 : i32
    %c0_i32_0 = arith.constant 0 : i32
    return %arg0, %arg1, %c0_i32 : i32, i32, i32
  }
  func.func @transform_1(%arg0: i32, %arg1: i32) -> (i32, i32, i32) {
    %c0_i32 = arith.constant 0 : i32
    %c0_i32_0 = arith.constant 0 : i32
    %c0_i32_1 = arith.constant 0 : i32
    return %arg0, %c0_i32, %c0_i32_0 : i32, i32, i32
  }
  func.func @transform_2(%arg0: i32, %arg1: i32) -> (i32, i32, i32) {
    %c0_i32 = arith.constant 0 : i32
    %c0_i32_0 = arith.constant 0 : i32
    return %arg0, %arg1, %c0_i32 : i32, i32, i32
  }
  func.func @transform_3(%arg0: i32, %arg1: i32) -> (i32, i32, i32, i32) {
    %c0_i32 = arith.constant 0 : i32
    %c0_i32_0 = arith.constant 0 : i32
    %c0_i32_1 = arith.constant 0 : i32
    return %arg0, %arg1, %c0_i32, %c0_i32_0 : i32, i32, i32, i32
  }
}

</mosaic_0001>

<bundles_post_ra>
// kernel: tpu_custom_call.1
= control target key start
LH: loop header
LB: loop body
LE: loop exit
PB: predicated region body
PF: predicated region fallthrough
CT: control target
= control target key end

     0   :  { %9 = vsyncpa [#allocation3], 0  ;;  %s1274_s0 = inlined_call_operand.vmem [shape: bf16[4,128,16], index: 0, kind: input, shape index: {}]   ;;  %s1275_s1 = inlined_call_operand.vmem [shape: bf16[4,16,128], index: 1, kind: input, shape index: {}]   ;;  %s1276_s2 = inlined_call_operand.hbm [shape: bf16[4,128,128], index: 2, kind: output, shape index: {0}]   ;;  %s1277_s3 = inlined_call_operand.hbm [shape: f32[4,1,2,128], index: 3, kind: output, shape index: {1}]  }
   0x1   :  { %11 = vsyncpa [#allocation3 + $0x1], 0 }
   0x2   :  { %12 = vsyncpa [#allocation5], 0 }
   0x3   :  { %14 = vsyncpa [#allocation5 + $0x1], 0  ;;  %s1069_s12 = smov 0   ;;  %s1071_s13 = smov 0  }
   0x4   :  { %s1073_s14 = smov 0   ;;  %s1075_s15 = smov 0  }
   0x5   :  { %s1077_s16 = smov 0   ;;  %s1079_s17 = smov 0  }
   0x6 LB: > { %s720_s18 = sadd.s32 4294967295, %s1043_s17   ;;  %s721_s19 = sadd.s32 4294967294, %s1043_s17   ;;  %s1043_s17 = sphi %s1079_s17, %s20_s17   ;;  %s1039_s16 = sphi %s1077_s16, %s1284_s16   ;;  %s1035_s15 = sphi %s1075_s15, %s1283_s15   ;;  %s1031_s14 = sphi %s1073_s14, %s1282_s14   ;;  %s1027_s13 = sphi %s1071_s13, %s1281_s13   ;;  %s1023_s12 = sphi %s1069_s12, %s1280_s12  }
   0x7   : > { %s32_s20 = sadd.s32 1, %s1039_s16  ;;  %s95_s21 = sadd.s32 1, %s1031_s14 }
   0x8   : > { %p34_p0 = scmp.ge.s32.totalorder %s32_s20, 4  ;;  %p105_p1 = scmp.ne.s32.totalorder %s1031_s14, %s1027_s13 }
   0x9   : > { %p106_p2 = scmp.eq.s32.totalorder %s720_s18, 3  ;;  %p111_p3 = scmp.ne.s32.totalorder %s1027_s13, %s1023_s12 }
   0xa   : > { %s1286_s20 = smov (%p34_p0, %s32_s20), 0  ;;  %p112_p5 = scmp.eq.s32.totalorder %s721_s19, 3 }
   0xb   : > { %p1109_p4 = por %p106_p2, %p105_p1  ;;  %s90_s23 = ssub.s32 %s1039_s16, %s1286_s20 }
   0xc   : > { %p724_p6 = scmp.ge.s32.totalorder %s1043_s17, 1  ;;  %p93_p7 = scmp.eq.s32.totalorder %s90_s23, 0 }
   0xd   : > { %p1116_p8 = por %p112_p5, %p111_p3  ;;  %p179_p9 = scmp.lt.s32.totalorder %s1043_s17, 5 }
   0xe   : > { %s1122_s25 = scalar_select %p93_p7, %s1031_s14, %s95_s21  }
   0xf   : > { %p180_p10 = pnand %p724_p6, %p179_p9 }
  0x10   : > { %p218_p11 = scmp.lt.s32.totalorder (!%p180_p10), %s1035_s15, 3  ;;  %s1141_s8 = sand.u32 (!%p180_p10), 1, %s1027_s13  }
  0x11   : > { %183 = sbr.rel (%p180_p10) target bundleno = 298 (0x12a), region = 28  ;;  %s725_s9 = sshll.u32 (!%p180_p10), %s1141_s8, 6 }
  0x12   : > { %s1150_s10 = scalar_lea.vmem (!%p180_p10), [#allocation2], %s725_s9  ;;  %s789_s11 = sshll.u32 (!%p180_p10), %s1035_s15, 10 }
  0x13   : > { %s582_s18 = sshll.u32 (!%p180_p10), %s1150_s10, 4  ;;  %s1176_s23 = scalar_lea.hbm (!%p180_p10), %s1276_s2, %s789_s11  ;;  %s1178_s18 = int_to_ptr.vmem [resolvable:$true] %s582_s18 }
  0x16   : > { %s219_s26 = scalar_select %p218_p11, %s1035_s15, 3  ;;  %vm298_vm0 = vcmask 130048  }
  0x18   : > { %s771_s27 = sshll.u32 %s219_s26, 6  ;;  %s772_s28 = sshll.u32 %s219_s26, 3 }
  0x19   : > { %s225_s4 = scalar_lea.vmem %s1274_s0, %s771_s27  ;;  %s231_s7 = scalar_lea.vmem %s1275_s1, %s772_s28 }
  0x1a   : > { %v928_v0 = vld [vmem:[%s231_s7] sm:$0xff]   ;;  %v930_v2 = vld [vmem:[%s225_s4 + $0x8] sm:$0xff]   ;;  %v931_v3 = vld [vmem:[%s225_s4 + $0x10] sm:$0xff]   ;;  %s562_s26 = scalar_lea.sflag [#allocation3], %s1141_s8  ;;  %s937_s27 = scalar_lea.vmem %s1178_s18, 1024 }
  0x1b   : > { %v929_v1 = vld [vmem:[%s225_s4] sm:$0xff]   ;;  %846 = vmatprep.subr.bf16.mxu0 %v928_v0  ;;  %864 = vmatprep.subr.bf16.mxu1 %v928_v0  ;;  %v934_v5 = vld [vmem:[%s225_s4 + $0x28] sm:$0xff]   ;;  %v935_v6 = vld [vmem:[%s225_s4 + $0x30] sm:$0xff]   ;;  %p938_p12 = scmp.ne.s32.totalorder %s1178_s18, %s937_s27  ;;  %s1045_s28 = smov [#allocation2]  }
  0x1c   : > { %847 = vmatpush3.bf16.msra.mxu0 %v928_v0  ;;  %848 = vmatprep.mubr.msk.bf16.mxu0 %vm298_vm0, %v929_v1  ;;  %v933_v4 = vld [vmem:[%s225_s4 + $0x20] sm:$0xff]   ;;  %v932_v7 = vld [vmem:[%s225_s4 + $0x18] sm:$0xff]   ;;  %s941_s29 = sshll.u32 %s1045_s28, 4  ;;  %s942_s29 = int_to_ptr.vmem [resolvable:$false] %s941_s29 }
  0x1d   : > { %865 = vmatpush3.bf16.msra.mxu1 %v928_v0  ;;  %856 = vmatprep.mubr.msk.bf16.mxu1 %vm298_vm0, %v933_v4  ;;  %v936_v8 = vld [vmem:[%s225_s4 + $0x38] sm:$0xff]   ;;  %p939_p13 = pnand %p938_p12, %p1109_p4  ;;  %s943_s30 = scalar_lea.vmem %s942_s29, 2048 }
  0x1e   : > { %p944_p1 = scmp.lt.s32.totalorder %s1178_s18, %s942_s29  ;;  %p945_p2 = scmp.lt.s32.totalorder %s943_s30, %s937_s27 }
  0x1f   : > { %849 = vmatmul.mubr.msk.bf16.vlgmr.msra.gmra.mxu0 %vm298_vm0, %v930_v2  ;;  %p940_p0 = pneg %p939_p13 }
  0x20   : > { %852 = vmatprep.mubr.msk.bf16.mxu0 %vm298_vm0, %v931_v3  ;;  %857 = vmatmul.mubr.msk.bf16.vlgmr.msra.gmra.mxu1 %vm298_vm0, %v934_v5  ;;  %p946_p3 = por %p945_p2, %p944_p1 }
  0x21   : > { %860 = vmatprep.mubr.msk.bf16.mxu1 %vm298_vm0, %v935_v6 }
  0x22   : > { %p947_p5 = pnand %p946_p3, %p940_p0 }
  0x27   : > { %853 = vmatmul.mubr.msk.bf16.gmra.mxu0 %vm298_vm0, %v932_v7 }
  0x28   : > { %861 = vmatmul.mubr.msk.bf16.gmra.mxu1 %vm298_vm0, %v936_v8 }
  0xdf   : > { %v850_v9 = vpop.f32.mrf.mxu0 }
  0xe0   : > { %v1144_v11 = vpop.f32.mrf.mxu1  ;;  %v523_v24 = vmul.f32 %v850_v9, %v850_v9 }
  0xe1   : > { %v357_v10 = vpop.f32.mrf.mxu0 }
  0xe2   : > { %v1146_v13 = vpop.f32.mrf.mxu1  ;;  %v521_v15 = vmul.f32 %v357_v10, %v357_v10 }
  0xe3   : > { %v851_v12 = vpop.f32.mrf.mxu0 }
  0xe4   : > { %v798_v14 = vpack.c.bf16 %v851_v12, %v850_v9  ;;  %v1148_v17 = vpop.f32.mrf.mxu1  ;;  %v524_v30 = vmul.f32 %v851_v12, %v851_v12 }
  0xe5   : > { %v360_v16 = vpop.f32.mrf.mxu0  ;;  %v818_v21 = vpack.c.bf16 %v1148_v17, %v1144_v11 }
  0xe6   : > { %830 = vst [vmem:[%s1150_s10 + $0x8] sm:$0xff] %v798_v14   ;;  %v793_v18 = vpack.c.bf16 %v360_v16, %v357_v10  ;;  %v500_v19 = vadd.f32 %v360_v16, %v357_v10  ;;  %v522_v20 = vmul.f32 %v360_v16, %v360_v16  ;;  %v1155_v23 = vpop.f32.mrf.mxu1 }
  0xe7   : > { %v854_v22 = vpop.f32.mrf.mxu0  ;;  %834 = vst [vmem:[%s1150_s10 + $0x28] sm:$0xff] %v818_v21   ;;  %v813_v27 = vpack.c.bf16 %v1155_v23, %v1146_v13 }
  0xe8   : > { %794 = vst [vmem:[%s1150_s10] sm:$0xff] %v793_v18   ;;  %v501_v25 = vadd.f32 %v850_v9, %v500_v19  ;;  %v537_v26 = vadd.f32 %v522_v20, %v521_v15  ;;  %v1161_v29 = vpop.f32.mrf.mxu1  ;;  %v527_v47 = vmul.f32 %v854_v22, %v854_v22 }
  0xe9   : > { %v373_v28 = vpop.f32.mrf.mxu0  ;;  %833 = vst [vmem:[%s1150_s10 + $0x20] sm:$0xff] %v813_v27  }
  0xea   : > { %v538_v31 = vadd.f32 %v537_v26, %v523_v24  ;;  %v502_v32 = vadd.f32 %v851_v12, %v501_v25  ;;  %v1164_v34 = vpop.f32.mrf.mxu1  ;;  %v525_v36 = vmul.f32 %v373_v28, %v373_v28 }
  0xeb   : > { %v855_v33 = vpop.f32.mrf.mxu0 }
  0xec   : > { %v503_v35 = vadd.f32 %v502_v32, %v373_v28  ;;  %v539_v37 = vadd.f32 %v538_v31, %v524_v30  ;;  %v808_v38 = vpack.c.bf16 %v855_v33, %v854_v22  ;;  %v1168_v40 = vpop.f32.mrf.mxu1  ;;  %v528_v51 = vmul.f32 %v855_v33, %v855_v33 }
  0xed   : > { %v376_v39 = vpop.f32.mrf.mxu0  ;;  %v828_v45 = vpack.c.bf16 %v1168_v40, %v1161_v29 }
  0xee   : > { %v540_v41 = vadd.f32 %v539_v37, %v525_v36  ;;  %832 = vst [vmem:[%s1150_s10 + $0x18] sm:$0xff] %v808_v38   ;;  %v803_v42 = vpack.c.bf16 %v376_v39, %v373_v28  ;;  %v504_v43 = vadd.f32 %v503_v35, %v376_v39  ;;  %v526_v44 = vmul.f32 %v376_v39, %v376_v39  ;;  %v408_v46 = vpop.f32.mrf.mxu1 }
  0xef   : > { %v823_v50 = vpack.c.bf16 %v408_v46, %v1164_v34  ;;  %836 = vst [vmem:[%s1150_s10 + $0x38] sm:$0xff] %v828_v45  }
  0xf0   : > { %831 = vst [vmem:[%s1150_s10 + $0x10] sm:$0xff] %v803_v42   ;;  %v505_v48 = vadd.f32 %v854_v22, %v504_v43  ;;  %v541_v49 = vadd.f32 %v540_v41, %v526_v44 }
  0xf1   : > { %835 = vst [vmem:[%s1150_s10 + $0x30] sm:$0xff] %v823_v50  }
  0xf2   : > { %v506_v52 = vadd.f32 %v855_v33, %v505_v48  ;;  %v542_v53 = vadd.f32 %v541_v49, %v527_v47 }
  0xf3   : > { %950 = shalt.err (!%p947_p5)
}
  0xf4   : > { %s951_s4 = scalar_lea.hbm %s1176_s23, 1024  ;;  %s955_s7 = scalar_lea.hbm %s1276_s2, 4096 }
  0xf5   : > { %p952_p6 = scmp.ne.s32.totalorder %s1176_s23, %s951_s4  ;;  %p956_p10 = scmp.lt.s32.totalorder %s1176_s23, %s1276_s2 }
  0xf6   : > { %p957_p11 = scmp.lt.s32.totalorder %s955_s7, %s951_s4 }
  0xf7   : > { %p953_p7 = pnand %p952_p6, %p1109_p4 }
  0xf8   : > { %p958_p12 = por %p957_p11, %p956_p10 }
  0xf9   : > { %p954_p9 = pneg %p953_p7 }
  0xfb   : > { %p959_p13 = pnand %p958_p12, %p954_p9 }
  0xfd   : > { %962 = shalt.err (!%p959_p13)
}
  0xfe   : > { %s1046_s11 = smov 64   ;;  %s1047_s19 = smov 4   ;;  %v529_v54 = vmul.f32 %v1146_v13, %v1146_v13  ;;  %v543_v55 = vadd.f32 %v542_v53, %v528_v51  ;;  %v507_v56 = vadd.f32 %v506_v52, %v1146_v13  ;;  %v530_v58 = vmul.f32 %v1155_v23, %v1155_v23 }
  0xff   : > { %866 = dma.vmem_to_hbm [thread:$0]  (%p1109_p4), %s1178_s18, 1024, %s1176_s23, %s562_s26, %s1046_s11, %s1046_s11, %s1047_s19   ;;  %v531_v60 = vmul.f32 %v1144_v11, %v1144_v11  ;;  %v532_v63 = vmul.f32 %v1148_v17, %v1148_v17  ;;  %v533_v3 = vmul.f32 %v1164_v34, %v1164_v34  ;;  %v534_v7 = vmul.f32 %v408_v46, %v408_v46 }
 0x100   : > { %v508_v57 = vadd.f32 %v507_v56, %v1155_v23  ;;  %v544_v59 = vadd.f32 %v543_v55, %v529_v54  ;;  %v535_v8 = vmul.f32 %v1161_v29, %v1161_v29  ;;  %s726_s18 = sshll.u32 %s1141_s8, 1  ;;  %s768_s21 = sshll.u32 %s1035_s15, 5  ;;  %vm558_vm1 = vcmask 1040384  }
 0x101   : > { %s216_s23 = scalar_lea.vmem [#allocation4], %s726_s18  ;;  %s1233_s29 = scalar_lea.hbm %s1277_s3, %s768_s21 }
 0x102   : > { %v509_v61 = vadd.f32 %v1144_v11, %v508_v57  ;;  %v545_v62 = vadd.f32 %v544_v59, %v530_v58  ;;  %v536_v11 = vmul.f32 %v1168_v40, %v1168_v40  ;;  %s599_s26 = sshll.u32 %s216_s23, 4  ;;  %s567_s30 = scalar_lea.sflag [#allocation5], %s1141_s8  ;;  %s600_s26 = int_to_ptr.vmem [resolvable:$true] %s599_s26 }
 0x103   : > { %s963_s4 = scalar_lea.vmem %s600_s26, 32  ;;  %s1048_s15 = smov [#allocation4]  }
 0x104   : > { %v546_v0 = vadd.f32 %v545_v62, %v531_v60  ;;  %v510_v1 = vadd.f32 %v1148_v17, %v509_v61  ;;  %p964_p0 = scmp.ne.s32.totalorder %s600_s26, %s963_s4  ;;  %s967_s5 = sshll.u32 %s1048_s15, 4  ;;  %s968_s5 = int_to_ptr.vmem [resolvable:$false] %s967_s5 }
 0x105   : > { %s969_s6 = scalar_lea.vmem %s968_s5, 64  ;;  %p970_p3 = scmp.lt.s32.totalorder %s600_s26, %s968_s5 }
 0x106   : > { %v511_v2 = vadd.f32 %v510_v1, %v1164_v34  ;;  %v547_v4 = vadd.f32 %v546_v0, %v532_v63  ;;  %p965_p1 = pnand %p964_p0, %p1109_p4  ;;  %p971_p5 = scmp.lt.s32.totalorder %s969_s6, %s963_s4 }
 0x108   : > { %v548_v5 = vadd.f32 %v547_v4, %v533_v3  ;;  %v512_v6 = vadd.f32 %v511_v2, %v408_v46  ;;  %p966_p2 = pneg %p965_p1  ;;  %p972_p6 = por %p971_p5, %p970_p3 }
 0x10a   : > { %v513_v9 = vadd.f32 %v1161_v29, %v512_v6  ;;  %v549_v10 = vadd.f32 %v548_v5, %v534_v7  ;;  %p973_p7 = pnand %p972_p6, %p966_p2 }
 0x10c   : > { %v514_v12 = vadd.f32 %v1168_v40, %v513_v9  ;;  %v550_v13 = vadd.f32 %v549_v10, %v535_v8 }
 0x10e   : > { %v515_v14 = vrot.slane %v514_v12, 4  ;;  %v551_v15 = vadd.f32 %v550_v13, %v536_v11 }
 0x110   : > { %v516_v16 = vadd.f32 %v515_v14, %v514_v12  ;;  %v552_v17 = vrot.slane %v551_v15, 4 }
 0x112   : > { %v517_v18 = vrot.slane %v516_v16, 2  ;;  %v553_v19 = vadd.f32 %v552_v17, %v551_v15 }
 0x114   : > { %v518_v20 = vadd.f32 %v517_v18, %v516_v16  ;;  %v554_v21 = vrot.slane %v553_v19, 2 }
 0x116   : > { %v519_v22 = vrot.slane %v518_v20, 1  ;;  %v555_v23 = vadd.f32 %v554_v21, %v553_v19 }
 0x118   : > { %v556_v24 = vrot.slane %v555_v23, 1  ;;  %v520_v25 = vadd.f32 %v519_v22, %v518_v20 }
 0x11a   : > { %v557_v26 = vadd.f32 %v556_v24, %v555_v23 }
 0x11c   : > { %v559_v27 = vsel %vm558_vm1, %v520_v25, %v557_v26 }
 0x11d   : > { %560 = vst [vmem:[%s216_s23] sm:$0x3] %v559_v27 }
 0x11e   : > { %976 = shalt.err (!%p973_p7)
}
 0x11f   : > { %s977_s7 = scalar_lea.hbm %s1233_s29, 32  ;;  %s981_s10 = scalar_lea.hbm %s1277_s3, 128 }
 0x120   : > { %p978_p9 = scmp.ne.s32.totalorder %s1233_s29, %s977_s7  ;;  %p982_p12 = scmp.lt.s32.totalorder %s1233_s29, %s1277_s3 }
 0x121   : > { %p983_p13 = scmp.lt.s32.totalorder %s981_s10, %s977_s7 }
 0x122   : > { %p979_p10 = pnand %p978_p9, %p1109_p4 }
 0x123   : > { %p984_p0 = por %p983_p13, %p982_p12 }
 0x124   : > { %p980_p11 = pneg %p979_p10 }
 0x126   : > { %p985_p1 = pnand %p984_p0, %p980_p11 }
 0x128   : > { %988 = shalt.err (!%p985_p1)
}
 0x129   : > { %867 = dma.vmem_to_hbm [thread:$0]  (%p1109_p4), %s600_s26, 32, %s1233_s29, %s567_s30  }
 0x12a PF: > { %p877_p2 = scmp.ge.s32.totalorder %s1043_s17, 2  ;;  %s611_s18 = sand.u32 1, %s1023_s12  }
 0x12b   : > { %s612_s21 = scalar_lea.sflag [#allocation3], %s611_s18 }
 0x12c   : > { %p871_p3 = pnand %p877_p2, %p1116_p8 }
 0x12e   : > { %p872_p5 = pneg %p871_p3 }
 0x130   : > { %1014 = dma.done.wait (%p872_p5), %s612_s21, 1024  }
 0x131   : > { %1016 = vsyncadd (%p872_p5), %s612_s21, 4294966272  ;;  %s621_s23 = scalar_lea.sflag [#allocation5], %s611_s18 }
 0x132   : > { %1018 = dma.done.wait (%p872_p5), %s621_s23, 32  }
 0x133   : > { %1020 = vsyncadd (%p872_p5), %s621_s23, 4294967264  ;;  %s20_s17 = sadd.s32 1, %s1043_s17   ;;  %s1280_s12 = smov %s1027_s13 }
 0x134   : > { %p17_p6 = scmp.ge.s32.totalorder %s20_s17, 6   ;;  %s1281_s13 = smov %s1031_s14 }
 0x135   : > { %s1282_s14 = smov %s1122_s25  ;;  %s1283_s15 = smov %s1039_s16 }
 0x136   : > { %s1284_s16 = smov %s1286_s20  ;;  %19 = sbr.rel (!%p17_p6) target bundleno = 6 (0x6), region = 83 }
 0x13b   :  { %626 = vsyncpa [#allocation3], 1 }
 0x13c   :  { %628 = vsyncpa [#allocation3 + $0x1], 1 }
 0x13d   :  { %629 = vsyncpa [#allocation5], 1 }
 0x13e   :  { %631 = vsyncpa [#allocation5 + $0x1], 1 }

</bundles_post_ra>
